<compile_context>
chip_gen: v7x
topology: tpu7x:2x2x1
jax: 0.10.0
libtpu: 0.0.40
codegen_flags: <defaults>
</compile_context>

<pallas_src>
import jax
import jax.numpy as jnp
from jax.experimental import pallas as pl
from jax.experimental.pallas import tpu as pltpu


def _round_up(x, m):
    return (x + m - 1) // m * m


def _cdiv(a, b):
    return (a + b - 1) // b


# ----------------------------------------------------------------------------
# Kernel: BN-folded classifier head = 3 matmuls + ReLU; biases packed in c_ref.
# ----------------------------------------------------------------------------
def _classifier_kernel(x_ref, w1_ref, w2_ref, w3_ref, c_ref, o_ref):
    n3 = o_ref.shape[-1]
    c1 = c_ref[:, 0:512]              # (1, 512)  f32
    c2 = c_ref[:, 512:768]            # (1, 256)  f32
    c3 = c_ref[:, 768:768 + n3]       # (1, Np)   f32

    x = x_ref[...]                                                     # bf16 (TB, Dp)
    h = jnp.dot(x, w1_ref[...], preferred_element_type=jnp.float32) + c1
    h = jnp.maximum(h, 0.0).astype(jnp.bfloat16)

    h = jnp.dot(h, w2_ref[...], preferred_element_type=jnp.float32) + c2
    h = jnp.maximum(h, 0.0).astype(jnp.bfloat16)

    out = jnp.dot(h, w3_ref[...], preferred_element_type=jnp.float32) + c3
    o_ref[...] = out.astype(o_ref.dtype)


# ----------------------------------------------------------------------------
# One-time parameter preparation (NOT in the per-call path).
# ----------------------------------------------------------------------------
def prepare_params(params, weight_dtype=jnp.bfloat16):
    """Fold eval-mode BN into the Linears, pad to lane-friendly shapes, pack biases."""
    (s0, t0, w1, c1, s1, t1, w2, c2, s2, t2, w3, c3) = params
    d0 = w1.shape[0]
    num_classes = w3.shape[1]

    # Exact f32 fold: (x*s + t) @ w + c == x @ (s[:,None]*w) + (t @ w + c)
    w1f = s0[:, None] * w1
    c1f = t0 @ w1 + c1
    w2f = s1[:, None] * w2
    c2f = t1 @ w2 + c2
    w3f = s2[:, None] * w3
    c3f = t2 @ w3 + c3

    Dp = _round_up(d0, 128)
    Np = _round_up(max(num_classes, 128), 128)

    w1_p = jnp.pad(w1f, ((0, Dp - d0), (0, 0))).astype(weight_dtype)          # (Dp, 512)
    w2_p = w2f.astype(weight_dtype)                                            # (512, 256)
    w3_p = jnp.pad(w3f, ((0, 0), (0, Np - num_classes))).astype(weight_dtype)  # (256, Np)
    c3_p = jnp.pad(c3f.reshape(1, -1), ((0, 0), (0, Np - num_classes)))        # (1, Np)
    c_packed = jnp.concatenate(
        [c1f.reshape(1, 512).astype(jnp.float32),
         c2f.reshape(1, 256).astype(jnp.float32),
         c3_p.astype(jnp.float32)],
        axis=1,
    )                                                                          # (1, 768+Np)

    return {
        "w1": w1_p, "w2": w2_p, "w3": w3_p, "c": c_packed,
        "d0": d0, "Dp": Dp, "Np": Np, "num_classes": num_classes,
    }


def _choose_tb(B):
    """Batch tile: multiple of 16 (bf16 sublane-packed), <=256, >=2 tiles when
    B > 16 (v7x megacore), minimal batch padding."""
    if B <= 16:
        return 16
    max_tb = 256
    n_tiles = max(2, _cdiv(B, max_tb))
    tb = _round_up(_cdiv(B, n_tiles), 16)
    return min(tb, max_tb)


# ----------------------------------------------------------------------------
# Per-call forward: reshape + bf16 cast (+ pad only if needed) + pallas_call.
# ----------------------------------------------------------------------------
def classifier_forward(x_nchw, prep, out_dtype=jnp.float32):
    """x_nchw: (B, 2*num_features, H, W) with H=W=1 (required by BatchNorm1d(2F))."""
    B = x_nchw.shape[0]
    d0, Dp, Np, nc = prep["d0"], prep["Dp"], prep["Np"], prep["num_classes"]

    x = x_nchw.reshape(B, -1)                     # Flatten
    assert x.shape[1] == d0, "BatchNorm1d(2F) requires flattened dim == 2F (H=W=1)"
    x = x.astype(jnp.bfloat16)                    # single cast, no f32 intermediate

    TB = _choose_tb(B)
    Bp = _round_up(B, TB)
    if Bp != B or Dp != d0:
        x = jnp.pad(x, ((0, Bp - B), (0, Dp - d0)))

    grid = (Bp // TB,)
    out = pl.pallas_call(
        _classifier_kernel,
        out_shape=jax.ShapeDtypeStruct((Bp, Np), out_dtype),
        grid=grid,
        in_specs=[
            pl.BlockSpec((TB, Dp), lambda i: (i, 0)),       # x: blocked over batch
            pl.BlockSpec((Dp, 512), lambda i: (0, 0)),      # w1: resident
            pl.BlockSpec((512, 256), lambda i: (0, 0)),     # w2: resident
            pl.BlockSpec((256, Np), lambda i: (0, 0)),      # w3: resident (lane-dense)
            pl.BlockSpec((1, 768 + Np), lambda i: (0, 0)),  # packed biases
        ],
        out_specs=pl.BlockSpec((TB, Np), lambda i: (i, 0)),
        compiler_params=pltpu.CompilerParams(
            dimension_semantics=("parallel",)),
    )(x, prep["w1"], prep["w2"], prep["w3"], prep["c"])

    if Bp != B or Np != nc:
        out = out[:B, :nc]
    return out


# ----------------------------------------------------------------------------
# Synthetic parameters + pure-JAX reference (same eval-mode semantics).
# ----------------------------------------------------------------------------
def make_params(key, num_features, num_classes):
    d0 = num_features * 2
    it = iter(jax.random.split(key, 18))

    def bn(dim):
        gamma = 1.0 + 0.1 * jax.random.normal(next(it), (dim,), jnp.float32)
        beta = 0.1 * jax.random.normal(next(it), (dim,), jnp.float32)
        running_mean = 0.05 * jax.random.normal(next(it), (dim,), jnp.float32)
        running_var = 1.0 + 0.1 * jax.random.uniform(next(it), (dim,), jnp.float32)
        inv_std = 1.0 / jnp.sqrt(running_var + 1e-5)
        scale = gamma * inv_std
        shift = beta - running_mean * scale
        return scale, shift

    def linear(din, dout):
        w = jax.random.normal(next(it), (din, dout), jnp.float32) * (1.0 / jnp.sqrt(din))
        b = 0.01 * jax.random.normal(next(it), (dout,), jnp.float32)
        return w, b

    s0, t0 = bn(d0)
    w1, c1 = linear(d0, 512)
    s1, t1 = bn(512)
    w2, c2 = linear(512, 256)
    s2, t2 = bn(256)
    w3, c3 = linear(256, num_classes)
    return (s0, t0, w1, c1, s1, t1, w2, c2, s2, t2, w3, c3)


def reference_forward(x_nchw, params):
    (s0, t0, w1, c1, s1, t1, w2, c2, s2, t2, w3, c3) = params
    x = x_nchw.reshape(x_nchw.shape[0], -1).astype(jnp.float32)
    h = jnp.maximum((x * s0 + t0) @ w1 + c1, 0.0)
    h = jnp.maximum((h * s1 + t1) @ w2 + c2, 0.0)
    return (h * s2 + t2) @ w3 + c3


if __name__ == "__main__":
    num_features = 64          # classifier input feature count F (module uses 2F)
    num_classes = 8
    B = 8

    key = jax.random.PRNGKey(0)
    k_x, k_p, k_x2 = jax.random.split(key, 3)

    # Backbone output in NCHW: (B, 2*num_features, 1, 1); flattened inside wrapper.
    x = jax.random.normal(k_x, (B, num_features * 2, 1, 1), jnp.float32)
    params = make_params(k_p, num_features, num_classes)

    # Prepare (BN fold + pad + pack + cast) ONCE, outside the per-call path.
    prep = jax.tree_util.tree_map(
        lambda a: a, prepare_params(params))  # concrete arrays, computed once

    out = classifier_forward(x, prep)
    out = jax.block_until_ready(out)

    ref = reference_forward(x, params)
    assert out.shape == (B, num_classes)
    # bf16 matmul operands with f32 accumulation -> loose tolerance vs f32 reference
    assert jnp.allclose(out, ref, atol=5e-2, rtol=5e-2), "mismatch vs reference"

    # Exercise the multi-tile + batch-padding path (B=40 -> TB=32, grid=(2,)).
    x2 = jax.random.normal(k_x2, (40, num_features * 2, 1, 1), jnp.float32)
    out2 = jax.block_until_ready(classifier_forward(x2, prep))
    ref2 = reference_forward(x2, params)
    assert out2.shape == (40, num_classes)
    assert jnp.allclose(out2, ref2, atol=5e-2, rtol=5e-2), "mismatch vs reference (B=40)"

    print("KERNEL_OK")
</pallas_src>

<mosaic_0001>
module attributes {stable_mosaic.version = 11 : i64} {
  func.func @_classifier_kernel(%arg0: i32, %arg1: memref<16x128xbf16, #tpu.memory_space<vmem>>, %arg2: memref<128x512xbf16, #tpu.memory_space<vmem>>, %arg3: memref<512x256xbf16, #tpu.memory_space<vmem>>, %arg4: memref<256x128xbf16, #tpu.memory_space<vmem>>, %arg5: memref<1x896xf32, #tpu.memory_space<vmem>>, %arg6: memref<16x128xf32, #tpu.memory_space<vmem>>) attributes {dimension_semantics = [#tpu.dimension_semantics<parallel>], iteration_bounds = array<i64: 1>, scalar_prefetch = 0 : i64, scratch_operands = 0 : i64, tpu.core_type = #tpu.core_type<tc>, window_params = [{transform_indices = @transform_0, window_bounds = array<i64: 16, 128>}, {pipeline_mode = #tpu.pipeline_mode<synchronous>, transform_indices = @transform_1, window_bounds = array<i64: 128, 512>}, {pipeline_mode = #tpu.pipeline_mode<synchronous>, transform_indices = @transform_2, window_bounds = array<i64: 512, 256>}, {pipeline_mode = #tpu.pipeline_mode<synchronous>, transform_indices = @transform_3, window_bounds = array<i64: 256, 128>}, {pipeline_mode = #tpu.pipeline_mode<synchronous>, transform_indices = @transform_4, window_bounds = array<i64: 1, 896>}, {transform_indices = @transform_5, window_bounds = array<i64: 16, 128>}]} {
    %c0 = arith.constant 0 : index
    %c0_0 = arith.constant 0 : index
    %0 = vector.load %arg5[%c0, %c0_0] : memref<1x896xf32, #tpu.memory_space<vmem>>, vector<1x512xf32>
    %c0_1 = arith.constant 0 : index
    %c512 = arith.constant 512 : index
    %1 = vector.load %arg5[%c0_1, %c512] : memref<1x896xf32, #tpu.memory_space<vmem>>, vector<1x256xf32>
    %c0_2 = arith.constant 0 : index
    %c768 = arith.constant 768 : index
    %2 = vector.load %arg5[%c0_2, %c768] : memref<1x896xf32, #tpu.memory_space<vmem>>, vector<1x128xf32>
    %c0_3 = arith.constant 0 : index
    %c0_4 = arith.constant 0 : index
    %3 = vector.load %arg1[%c0_3, %c0_4] : memref<16x128xbf16, #tpu.memory_space<vmem>>, vector<16x128xbf16>
    %c0_5 = arith.constant 0 : index
    %c0_6 = arith.constant 0 : index
    %4 = vector.load %arg2[%c0_5, %c0_6] : memref<128x512xbf16, #tpu.memory_space<vmem>>, vector<128x512xbf16>
    %cst = arith.constant dense<0.000000e+00> : vector<16x512xf32>
    %5 = tpu.matmul %3, %4, %cst {dimension_numbers = #tpu.dot_dimension_numbers<[1], [0], [0], [1], [0, 0, 1, 1], [], []>} : vector<16x128xbf16>, vector<128x512xbf16>, vector<16x512xf32> -> vector<16x512xf32>
    %6 = vector.broadcast %0 : vector<1x512xf32> to vector<16x512xf32>
    %7 = arith.addf %5, %6 : vector<16x512xf32>
    %cst_7 = arith.constant 0.000000e+00 : f32
    %8 = vector.broadcast %cst_7 : f32 to vector<16x512xf32>
    %9 = arith.maximumf %7, %8 : vector<16x512xf32>
    %10 = arith.truncf %9 : vector<16x512xf32> to vector<16x512xbf16>
    %c0_8 = arith.constant 0 : index
    %c0_9 = arith.constant 0 : index
    %11 = vector.load %arg3[%c0_8, %c0_9] : memref<512x256xbf16, #tpu.memory_space<vmem>>, vector<512x256xbf16>
    %cst_10 = arith.constant dense<0.000000e+00> : vector<16x256xf32>
    %12 = tpu.matmul %10, %11, %cst_10 {dimension_numbers = #tpu.dot_dimension_numbers<[1], [0], [0], [1], [0, 0, 1, 1], [], []>} : vector<16x512xbf16>, vector<512x256xbf16>, vector<16x256xf32> -> vector<16x256xf32>
    %13 = vector.broadcast %1 : vector<1x256xf32> to vector<16x256xf32>
    %14 = arith.addf %12, %13 : vector<16x256xf32>
    %cst_11 = arith.constant 0.000000e+00 : f32
    %15 = vector.broadcast %cst_11 : f32 to vector<16x256xf32>
    %16 = arith.maximumf %14, %15 : vector<16x256xf32>
    %17 = arith.truncf %16 : vector<16x256xf32> to vector<16x256xbf16>
    %c0_12 = arith.constant 0 : index
    %c0_13 = arith.constant 0 : index
    %18 = vector.load %arg4[%c0_12, %c0_13] : memref<256x128xbf16, #tpu.memory_space<vmem>>, vector<256x128xbf16>
    %cst_14 = arith.constant dense<0.000000e+00> : vector<16x128xf32>
    %19 = tpu.matmul %17, %18, %cst_14 {dimension_numbers = #tpu.dot_dimension_numbers<[1], [0], [0], [1], [0, 0, 1, 1], [], []>} : vector<16x256xbf16>, vector<256x128xbf16>, vector<16x128xf32> -> vector<16x128xf32>
    %20 = vector.broadcast %2 : vector<1x128xf32> to vector<16x128xf32>
    %21 = arith.addf %19, %20 : vector<16x128xf32>
    %c0_15 = arith.constant 0 : index
    %c0_16 = arith.constant 0 : index
    %22 = vector.load %arg6[%c0_15, %c0_16] : memref<16x128xf32, #tpu.memory_space<vmem>>, vector<16x128xf32>
    tpu.vector_store %arg6[%c0_15, %c0_16], %21 {strides = array<i32>} : memref<16x128xf32, #tpu.memory_space<vmem>>, vector<16x128xf32>,
    return
  }
  func.func @transform_0(%arg0: i32) -> (i32, i32) {
    %c0_i32 = arith.constant 0 : i32
    %c0_i32_0 = arith.constant 0 : i32
    return %arg0, %c0_i32 : i32, i32
  }
  func.func @transform_1(%arg0: i32) -> (i32, i32) {
    %c0_i32 = arith.constant 0 : i32
    %c0_i32_0 = arith.constant 0 : i32
    %c0_i32_1 = arith.constant 0 : i32
    return %c0_i32, %c0_i32_0 : i32, i32
  }
  func.func @transform_2(%arg0: i32) -> (i32, i32) {
    %c0_i32 = arith.constant 0 : i32
    %c0_i32_0 = arith.constant 0 : i32
    %c0_i32_1 = arith.constant 0 : i32
    return %c0_i32, %c0_i32_0 : i32, i32
  }
  func.func @transform_3(%arg0: i32) -> (i32, i32) {
    %c0_i32 = arith.constant 0 : i32
    %c0_i32_0 = arith.constant 0 : i32
    %c0_i32_1 = arith.constant 0 : i32
    return %c0_i32, %c0_i32_0 : i32, i32
  }
  func.func @transform_4(%arg0: i32) -> (i32, i32) {
    %c0_i32 = arith.constant 0 : i32
    %c0_i32_0 = arith.constant 0 : i32
    %c0_i32_1 = arith.constant 0 : i32
    return %c0_i32, %c0_i32_0 : i32, i32
  }
  func.func @transform_5(%arg0: i32) -> (i32, i32) {
    %c0_i32 = arith.constant 0 : i32
    %c0_i32_0 = arith.constant 0 : i32
    return %arg0, %c0_i32 : i32, i32
  }
}

</mosaic_0001>

<bundles_post_ra>
// kernel: tpu_custom_call.1
= control target key start
LH: loop header
LB: loop body
LE: loop exit
PB: predicated region body
PF: predicated region fallthrough
CT: control target
= control target key end

     0   :  { %10 = vsyncpa [#allocation3], 0  ;;  %s1658_s0 = inlined_call_operand.hbm [shape: bf16[16,128], index: 0, kind: input, shape index: {}]   ;;  %s1659_s1 = inlined_call_operand.hbm [shape: bf16[128,512], index: 1, kind: input, shape index: {}]   ;;  %s1660_s2 = inlined_call_operand.hbm [shape: bf16[512,256], index: 2, kind: input, shape index: {}]   ;;  %s1661_s3 = inlined_call_operand.hbm [shape: bf16[256,128], index: 3, kind: input, shape index: {}]   ;;  %s1662_s4 = inlined_call_operand.vmem [shape: f32[1,896], index: 4, kind: input, shape index: {}]   ;;  %s1663_s5 = inlined_call_operand.hbm [shape: f32[16,128], index: 5, kind: output, shape index: {}]  }
   0x1   :  { %11 = vsyncpa [#allocation6], 0 }
   0x2   :  { %12 = vsyncpa [#allocation9], 0 }
   0x3   :  { %13 = vsyncpa [#allocation4], 0  ;;  %s1517_s18 = smov [#allocation5]   ;;  %s1399_s22 = scalar_lea.hbm %s1659_s1, 4096 }
   0x4   :  { %s31_s19 = sshll.u32 %s1517_s18, 4  ;;  %p1400_p0 = scmp.ne.s32.totalorder %s1659_s1, %s1399_s22  ;;  %s32_s19 = int_to_ptr.vmem [resolvable:$true] %s31_s19 }
   0x5   :  { %p1403_p1 = scmp.lt.u32.totalorder %s1399_s22, %s1659_s1 }
   0x7   :  { %p1405_p2 = pnand %p1403_p1, %p1400_p0 }
   0x9   :  { %1408 = shalt.err (!%p1405_p2)
}
   0xa   :  { %s1409_s27 = scalar_lea.vmem %s32_s19, 4096  ;;  %p1414_p4 = scmp.lt.s32.totalorder %s32_s19, %s32_s19 }
   0xb   :  { %p1410_p3 = scmp.ne.s32.totalorder %s32_s19, %s1409_s27  ;;  %p1415_p5 = scmp.lt.s32.totalorder %s1409_s27, %s1409_s27 }
   0xd   :  { %p1416_p6 = por %p1415_p5, %p1414_p4 }
   0xf   :  { %p1417_p7 = pnand %p1416_p6, %p1410_p3 }
  0x11   :  { %1420 = shalt.err (!%p1417_p7)
}
  0x12   :  { %s1518_s28 = smov 256   ;;  %s1519_s29 = smov 16  }
  0x13   :  { %37 = dma.hbm_to_vmem [thread:$0]  %s1659_s1, 4096, %s32_s19, [#allocation6], %s1518_s28, %s1518_s28, %s1519_s29  }
  0x14   :  { %s1520_s7 = smov [#allocation2]   ;;  %s1421_s11 = scalar_lea.hbm %s1658_s0, 128 }
  0x15   :  { %s19_s8 = sshll.u32 %s1520_s7, 4  ;;  %p1422_p8 = scmp.ne.s32.totalorder %s1658_s0, %s1421_s11  ;;  %s20_s8 = int_to_ptr.vmem [resolvable:$true] %s19_s8 }
  0x16   :  { %p1425_p9 = scmp.lt.u32.totalorder %s1421_s11, %s1658_s0 }
  0x18   :  { %p1427_p10 = pnand %p1425_p9, %p1422_p8 }
  0x1a   :  { %1430 = shalt.err (!%p1427_p10)
}
  0x1b   :  { %s1431_s16 = scalar_lea.vmem %s20_s8, 128  ;;  %p1436_p12 = scmp.lt.s32.totalorder %s20_s8, %s20_s8 }
  0x1c   :  { %p1432_p11 = scmp.ne.s32.totalorder %s20_s8, %s1431_s16  ;;  %p1437_p13 = scmp.lt.s32.totalorder %s1431_s16, %s1431_s16 }
  0x1e   :  { %p1438_p0 = por %p1437_p13, %p1436_p12 }
  0x20   :  { %p1439_p1 = pnand %p1438_p0, %p1432_p11 }
  0x22   :  { %1442 = shalt.err (!%p1439_p1)
}
  0x23   :  { %s1521_s1 = smov 64   ;;  %s1522_s17 = smov 4  }
  0x24   :  { %25 = dma.hbm_to_vmem [thread:$0]  %s1658_s0, 128, %s20_s8, [#allocation3], %s1521_s1, %s1521_s1, %s1522_s17  }
  0x25   :  { %s1523_s20 = smov [#allocation7]   ;;  %s1443_s24 = scalar_lea.hbm %s1660_s2, 8192 }
  0x26   :  { %s43_s21 = sshll.u32 %s1523_s20, 4  ;;  %p1444_p2 = scmp.ne.s32.totalorder %s1660_s2, %s1443_s24  ;;  %s44_s21 = int_to_ptr.vmem [resolvable:$true] %s43_s21 }
  0x27   :  { %p1447_p3 = scmp.lt.u32.totalorder %s1443_s24, %s1660_s2 }
  0x29   :  { %p1449_p4 = pnand %p1447_p3, %p1444_p2 }
  0x2b   :  { %1452 = shalt.err (!%p1449_p4)
}
  0x2c   :  { %s1453_s29 = scalar_lea.vmem %s44_s21, 8192  ;;  %p1458_p6 = scmp.lt.s32.totalorder %s44_s21, %s44_s21 }
  0x2d   :  { %p1454_p5 = scmp.ne.s32.totalorder %s44_s21, %s1453_s29  ;;  %p1459_p7 = scmp.lt.s32.totalorder %s1453_s29, %s1453_s29 }
  0x2f   :  { %p1460_p8 = por %p1459_p7, %p1458_p6 }
  0x31   :  { %p1461_p9 = pnand %p1460_p8, %p1454_p5 }
  0x33   :  { %1464 = shalt.err (!%p1461_p9)
}
  0x34   :  { %s1524_s0 = smov 128   ;;  %s1525_s30 = smov 8  }
  0x35   :  { %49 = dma.hbm_to_vmem [thread:$0]  %s1660_s2, 8192, %s44_s21, [#allocation6], %s1524_s0, %s1524_s0, %s1525_s30  }
  0x36   :  { %s1526_s8 = smov [#allocation8]   ;;  %s1465_s12 = scalar_lea.hbm %s1661_s3, 2048 }
  0x37   :  { %s55_s9 = sshll.u32 %s1526_s8, 4  ;;  %p1466_p10 = scmp.ne.s32.totalorder %s1661_s3, %s1465_s12  ;;  %s56_s9 = int_to_ptr.vmem [resolvable:$true] %s55_s9 }
  0x38   :  { %p1469_p11 = scmp.lt.u32.totalorder %s1465_s12, %s1661_s3 }
  0x3a   :  { %p1471_p12 = pnand %p1469_p11, %p1466_p10 }
  0x3c   :  { %1474 = shalt.err (!%p1471_p12)
}
  0x3d   :  { %s1475_s18 = scalar_lea.vmem %s56_s9, 2048  ;;  %p1480_p0 = scmp.lt.s32.totalorder %s56_s9, %s56_s9 }
  0x3e   :  { %p1476_p13 = scmp.ne.s32.totalorder %s56_s9, %s1475_s18  ;;  %p1481_p1 = scmp.lt.s32.totalorder %s1475_s18, %s1475_s18 }
  0x40   :  { %p1482_p2 = por %p1481_p1, %p1480_p0 }
  0x42   :  { %p1483_p3 = pnand %p1482_p2, %p1476_p13 }
  0x44   :  { %1486 = shalt.err (!%p1483_p3)
}
  0x45   :  { %61 = dma.hbm_to_vmem [thread:$0]  %s1661_s3, 2048, %s56_s9, [#allocation9], %s1521_s1, %s1521_s1, %s1522_s17  }
  0x46   :  { %1509 = dma.done.wait [#allocation3], 128  }
  0x47   :  { %1510 = vsyncadd [#allocation3], 4294967168 }
  0x48   :  { %1511 = dma.done.wait [#allocation6], 12288  }
  0x49   :  { %1512 = vsyncadd [#allocation6], 4294955008 }
  0x4a   :  { %1513 = dma.done.wait [#allocation9], 2048  }
  0x4b   :  { %1514 = vsyncadd [#allocation9], 4294965248  ;;  %v1527_v0 = vmov 0   ;;  %v1238_v1 = vld [vmem:[#allocation5 + $0x4] ss:$16 sps:$4 sm:$0xff]   ;;  %v1616_v23 = vld [vmem:[#allocation2] sm:$0xff]  }
  0x4c   :  { %333 = vmatprep.mubr.bf16.mxu1 %v1527_v0  ;;  %v1240_v2 = vld [vmem:[#allocation5] ss:$16 sps:$4 sm:$0xff]   ;;  %301 = vmatprep.subr.bf16.mxu1 %v1238_v1  ;;  %v1241_v3 = vld [vmem:[#allocation5 + $0x24] ss:$16 sps:$4 sm:$0xff]   ;;  %v1265_v22 = vld [vmem:[#allocation5 + $0xc] ss:$16 sps:$4 sm:$0xff]  }
  0x4d   :  { %302 = vmatpush1.bf16.msra.mxu1 %v1240_v2  ;;  %v1243_v4 = vld [vmem:[#allocation5 + $0x20] ss:$16 sps:$4 sm:$0xff]   ;;  %v1244_v5 = vld [vmem:[#allocation5 + $0x44] ss:$16 sps:$4 sm:$0xff]   ;;  %v1263_v25 = vld [vmem:[#allocation5 + $0x8] ss:$16 sps:$4 sm:$0xff]  }
  0x4e   :  { %303 = vmatprep.subr.bf16.mxu1 %v1241_v3  ;;  %v1246_v6 = vld [vmem:[#allocation5 + $0x40] ss:$16 sps:$4 sm:$0xff]   ;;  %v1247_v7 = vld [vmem:[#allocation5 + $0x64] ss:$16 sps:$4 sm:$0xff]   ;;  %v1268_v26 = vld [vmem:[#allocation5 + $0x2c] ss:$16 sps:$4 sm:$0xff]  }
  0x4f   :  { %v1249_v8 = vld [vmem:[#allocation5 + $0x60] ss:$16 sps:$4 sm:$0xff]   ;;  %v1250_v9 = vld [vmem:[#allocation5 + $0x84] ss:$16 sps:$4 sm:$0xff]   ;;  %v1266_v29 = vld [vmem:[#allocation5 + $0x28] ss:$16 sps:$4 sm:$0xff]  }
  0x50   :  { %v1252_v10 = vld [vmem:[#allocation5 + $0x80] ss:$16 sps:$4 sm:$0xff]   ;;  %v1253_v11 = vld [vmem:[#allocation5 + $0xa4] ss:$16 sps:$4 sm:$0xff]   ;;  %v1271_v31 = vld [vmem:[#allocation5 + $0x4c] ss:$16 sps:$4 sm:$0xff]  }
  0x51   :  { %304 = vmatpush1.bf16.msra.mxu1 %v1243_v4  ;;  %v1255_v12 = vld [vmem:[#allocation5 + $0xa0] ss:$16 sps:$4 sm:$0xff]   ;;  %v1256_v13 = vld [vmem:[#allocation5 + $0xc4] ss:$16 sps:$4 sm:$0xff]   ;;  %v1269_v33 = vld [vmem:[#allocation5 + $0x48] ss:$16 sps:$4 sm:$0xff]  }
  0x52   :  { %305 = vmatprep.subr.bf16.mxu1 %v1244_v5  ;;  %v1258_v14 = vld [vmem:[#allocation5 + $0xc0] ss:$16 sps:$4 sm:$0xff]   ;;  %v1287_v15 = vld [vmem:[#allocation7 + $0x4] ss:$8 sps:$4 sm:$0xff]   ;;  %v1290_v18 = vld [vmem:[#allocation7 + $0x14] ss:$8 sps:$4 sm:$0xff]  }
  0x53   :  { %v1289_v16 = vld [vmem:[#allocation7] ss:$8 sps:$4 sm:$0xff]   ;;  %v1259_v17 = vld [vmem:[#allocation5 + $0xe4] ss:$16 sps:$4 sm:$0xff]   ;;  %794 = vmatprep.subr.bf16.mxu0 %v1287_v15  ;;  %v1292_v19 = vld [vmem:[#allocation7 + $0x10] ss:$8 sps:$4 sm:$0xff]  }
  0x54   :  { %795 = vmatpush1.bf16.msra.mxu0 %v1289_v16  ;;  %v1261_v20 = vld [vmem:[#allocation5 + $0xe0] ss:$16 sps:$4 sm:$0xff]   ;;  %v1293_v21 = vld [vmem:[#allocation7 + $0x24] ss:$8 sps:$4 sm:$0xff]   ;;  %v1296_v27 = vld [vmem:[#allocation7 + $0x34] ss:$8 sps:$4 sm:$0xff]  }
  0x55   :  { %306 = vmatpush1.bf16.msra.mxu1 %v1246_v6  ;;  %796 = vmatprep.subr.bf16.mxu0 %v1290_v18  ;;  %v1295_v24 = vld [vmem:[#allocation7 + $0x20] ss:$8 sps:$4 sm:$0xff]   ;;  %v1298_v28 = vld [vmem:[#allocation7 + $0x30] ss:$8 sps:$4 sm:$0xff]   ;;  %v1299_v30 = vld [vmem:[#allocation7 + $0x44] ss:$8 sps:$4 sm:$0xff]  }
  0x56   :  { %307 = vmatprep.subr.bf16.mxu1 %v1247_v7  ;;  %v1301_v32 = vld [vmem:[#allocation7 + $0x40] ss:$8 sps:$4 sm:$0xff]   ;;  %v1302_v34 = vld [vmem:[#allocation7 + $0x54] ss:$8 sps:$4 sm:$0xff]   ;;  %v1304_v36 = vld [vmem:[#allocation7 + $0x50] ss:$8 sps:$4 sm:$0xff]  }
  0x57   :  { %v1274_v35 = vld [vmem:[#allocation5 + $0x6c] ss:$16 sps:$4 sm:$0xff]   ;;  %v1272_v37 = vld [vmem:[#allocation5 + $0x68] ss:$16 sps:$4 sm:$0xff]   ;;  %v1383_v3 = vld [vmem:[#allocation8 + $0x40] sm:$0xff]   ;;  %s1528_s23 = smov [#allocation10]  }
  0x58   :  { %797 = vmatpush1.bf16.msra.mxu0 %v1292_v19  ;;  %v1305_v38 = vld [vmem:[#allocation7 + $0x64] ss:$8 sps:$4 sm:$0xff]   ;;  %v1307_v40 = vld [vmem:[#allocation7 + $0x60] ss:$8 sps:$4 sm:$0xff]   ;;  %v1308_v42 = vld [vmem:[#allocation7 + $0x74] ss:$8 sps:$4 sm:$0xff]  }
  0x59   :  { %308 = vmatpush1.bf16.msra.mxu1 %v1249_v8  ;;  %798 = vmatprep.subr.bf16.mxu0 %v1293_v21  ;;  %v1277_v39 = vld [vmem:[#allocation5 + $0x8c] ss:$16 sps:$4 sm:$0xff]   ;;  %v1275_v41 = vld [vmem:[#allocation5 + $0x88] ss:$16 sps:$4 sm:$0xff]   ;;  %v1384_v4 = vld [vmem:[#allocation8] sm:$0xff]   ;;  %s1068_s24 = sshll.u32 %s1528_s23, 4  ;;  %s1069_s24 = int_to_ptr.vmem [resolvable:$true] %s1068_s24 }
  0x5a   :  { %309 = vmatprep.subr.bf16.mxu1 %v1250_v9  ;;  %v1280_v43 = vld [vmem:[#allocation5 + $0xac] ss:$16 sps:$4 sm:$0xff]   ;;  %v1310_v44 = vld [vmem:[#allocation7 + $0x70] ss:$8 sps:$4 sm:$0xff]   ;;  %v1313_v48 = vld [vmem:[#allocation7 + $0x80] ss:$8 sps:$4 sm:$0xff]   ;;  %p1492_p5 = scmp.lt.s32.totalorder %s1069_s24, %s1069_s24 }
  0x5b   :  { %v1278_v45 = vld [vmem:[#allocation5 + $0xa8] ss:$16 sps:$4 sm:$0xff]   ;;  %v1311_v46 = vld [vmem:[#allocation7 + $0x84] ss:$8 sps:$4 sm:$0xff]   ;;  %v1314_v50 = vld [vmem:[#allocation7 + $0x94] ss:$8 sps:$4 sm:$0xff]  }
  0x5c   :  { %799 = vmatpush1.bf16.msra.mxu0 %v1295_v24  ;;  %v1283_v47 = vld [vmem:[#allocation5 + $0xcc] ss:$16 sps:$4 sm:$0xff]   ;;  %v1281_v49 = vld [vmem:[#allocation5 + $0xc8] ss:$16 sps:$4 sm:$0xff]   ;;  %v1387_v7 = vld [vmem:[#allocation8 + $0x50] sm:$0xff]   ;;  %s1487_s25 = scalar_lea.vmem %s1069_s24, 256 }
  0x5d   :  { %310 = vmatpush1.bf16.msra.mxu1 %v1252_v10  ;;  %800 = vmatprep.subr.bf16.mxu0 %v1296_v27  ;;  %v1286_v51 = vld [vmem:[#allocation5 + $0xec] ss:$16 sps:$4 sm:$0xff]   ;;  %v1316_v52 = vld [vmem:[#allocation7 + $0x90] ss:$8 sps:$4 sm:$0xff]   ;;  %v1319_v55 = vld [vmem:[#allocation7 + $0xa0] ss:$8 sps:$4 sm:$0xff]   ;;  %p1488_p4 = scmp.ne.s32.totalorder %s1069_s24, %s1487_s25  ;;  %p1493_p6 = scmp.lt.s32.totalorder %s1487_s25, %s1487_s25 }
  0x5e   :  { %311 = vmatprep.subr.bf16.mxu1 %v1253_v11  ;;  %v1284_v53 = vld [vmem:[#allocation5 + $0xe8] ss:$16 sps:$4 sm:$0xff]   ;;  %v1317_v54 = vld [vmem:[#allocation7 + $0xa4] ss:$8 sps:$4 sm:$0xff]   ;;  %v1320_v56 = vld [vmem:[#allocation7 + $0xb4] ss:$8 sps:$4 sm:$0xff]  }
  0x5f   :  { %v1322_v57 = vld [vmem:[#allocation7 + $0xb0] ss:$8 sps:$4 sm:$0xff]   ;;  %v1323_v58 = vld [vmem:[#allocation7 + $0xc4] ss:$8 sps:$4 sm:$0xff]   ;;  %v1325_v59 = vld [vmem:[#allocation7 + $0xc0] ss:$8 sps:$4 sm:$0xff]   ;;  %p1494_p7 = por %p1493_p6, %p1492_p5 }
  0x60   :  { %801 = vmatpush1.bf16.msra.mxu0 %v1298_v28  ;;  %v1326_v60 = vld [vmem:[#allocation7 + $0xd4] ss:$8 sps:$4 sm:$0xff]   ;;  %v1328_v61 = vld [vmem:[#allocation7 + $0xd0] ss:$8 sps:$4 sm:$0xff]   ;;  %v1329_v62 = vld [vmem:[#allocation7 + $0xe4] ss:$8 sps:$4 sm:$0xff]  }
  0x61   :  { %312 = vmatpush1.bf16.msra.mxu1 %v1255_v12  ;;  %802 = vmatprep.subr.bf16.mxu0 %v1299_v30  ;;  %v1331_v63 = vld [vmem:[#allocation7 + $0xe0] ss:$8 sps:$4 sm:$0xff]   ;;  %v1334_v1 = vld [vmem:[#allocation7 + $0xf0] ss:$8 sps:$4 sm:$0xff]   ;;  %v1337_v2 = vld [vmem:[#allocation7 + $0x104] ss:$8 sps:$4 sm:$0xff]   ;;  %p1495_p8 = pnand %p1494_p7, %p1488_p4 }
  0x62   :  { %313 = vmatprep.subr.bf16.mxu1 %v1256_v13  ;;  %v1385_v5 = vld [vmem:[#allocation8 + $0x48] sm:$0xff]   ;;  %v1388_v8 = vld [vmem:[#allocation8 + $0x10] sm:$0xff]   ;;  %v1389_v9 = vld [vmem:[#allocation8 + $0x58] sm:$0xff]  }
  0x63   :  { %v1386_v6 = vld [vmem:[#allocation8 + $0x8] sm:$0xff]   ;;  %v1390_v10 = vld [vmem:[#allocation8 + $0x18] sm:$0xff]   ;;  %v1391_v11 = vld [vmem:[#allocation8 + $0x60] sm:$0xff]  }
  0x64   :  { %803 = vmatpush1.bf16.msra.mxu0 %v1301_v32  ;;  %v1392_v12 = vld [vmem:[#allocation8 + $0x20] sm:$0xff]   ;;  %v1393_v13 = vld [vmem:[#allocation8 + $0x68] sm:$0xff]  }
  0x65   :  { %314 = vmatpush1.bf16.msra.mxu1 %v1258_v14  ;;  %804 = vmatprep.subr.bf16.mxu0 %v1302_v34  ;;  %v115_v14 = vlaneseq }
  0x66   :  { %315 = vmatprep.subr.bf16.mxu1 %v1259_v17  ;;  %v77_v17 = vld [vmem:[%s1662_s4] sm:$0xf] }
  0x67   :  { %v1620_v15 = vshrl.u32 %v115_v14, 7  ;;  %v1376_v14 = vld [vmem:[#allocation7 + $0x1d4] ss:$8 sps:$4 sm:$0xff]  }
  0x68   :  { %805 = vmatpush1.bf16.msra.mxu0 %v1304_v36  ;;  %v1340_v36 = vld [vmem:[#allocation7 + $0x114] ss:$8 sps:$4 sm:$0xff]  }
  0x69   :  { %316 = vmatpush1.bf16.msra.mxu1 %v1261_v20  ;;  %806 = vmatprep.subr.bf16.mxu0 %v1305_v38  ;;  %v117_v16 = vsub.s32 0, %v1620_v15  ;;  %v121_v18 = vsub.s32 1, %v1620_v15  ;;  %v1343_v38 = vld [vmem:[#allocation7 + $0x124] ss:$8 sps:$4 sm:$0xff]  }
  0x6a   :  { %344 = vmatprep.subr.bf16.mxu1 %v1265_v22 }
  0x6b   :  { %v118_v19 = vrot.slane %v77_v17, %v117_v16  ;;  %v122_v20 = vrot.slane %v77_v17, %v121_v18 }
  0x6c   :  { %334 = vmatmul.mubr.bf16.vlgmr.msra.gmra.mrb[0].mxu1 %v1616_v23  ;;  %807 = vmatpush1.bf16.msra.mxu0 %v1307_v40  ;;  %v1346_v40 = vld [vmem:[#allocation7 + $0x134] ss:$8 sps:$4 sm:$0xff]  }
  0x6d   :  { %345 = vmatpush1.bf16.msra.mxu1 %v1263_v25  ;;  %376 = vmatprep.mubr.bf16.mxu1 %v1527_v0  ;;  %v1332_v0 = vld [vmem:[#allocation7 + $0xf4] ss:$8 sps:$4 sm:$0xff]  }
  0x6e   :  { %346 = vmatprep.subr.bf16.mxu1 %v1268_v26  ;;  %808 = vmatprep.subr.bf16.mxu0 %v1308_v42  ;;  %v1349_v42 = vld [vmem:[#allocation7 + $0x144] ss:$8 sps:$4 sm:$0xff]  }
  0x70   :  { %809 = vmatpush1.bf16.msra.mxu0 %v1310_v44  ;;  %v1352_v44 = vld [vmem:[#allocation7 + $0x154] ss:$8 sps:$4 sm:$0xff]  }
  0x71   :  { %347 = vmatpush1.bf16.msra.mxu1 %v1266_v29  ;;  %810 = vmatprep.subr.bf16.mxu0 %v1311_v46  ;;  %v129_v46 = vsub.s32 3, %v1620_v15 }
  0x72   :  { %348 = vmatprep.subr.bf16.mxu1 %v1271_v31 }
  0x74   :  { %811 = vmatpush1.bf16.msra.mxu0 %v1313_v48  ;;  %v1355_v48 = vld [vmem:[#allocation7 + $0x164] ss:$8 sps:$4 sm:$0xff]  }
  0x75   :  { %349 = vmatpush1.bf16.msra.mxu1 %v1269_v33  ;;  %812 = vmatprep.subr.bf16.mxu0 %v1314_v50  ;;  %v130_v50 = vrot.slane %v77_v17, %v129_v46 }
  0x76   :  { %350 = vmatprep.subr.bf16.mxu1 %v1274_v35  ;;  %v1335_v35 = vld [vmem:[#allocation7 + $0x100] ss:$8 sps:$4 sm:$0xff]  }
  0x78   :  { %813 = vmatpush1.bf16.msra.mxu0 %v1316_v52 }
  0x79   :  { %351 = vmatpush1.bf16.msra.mxu1 %v1272_v37  ;;  %814 = vmatprep.subr.bf16.mxu0 %v1317_v54  ;;  %v1338_v37 = vld [vmem:[#allocation7 + $0x110] ss:$8 sps:$4 sm:$0xff]  }
  0x7a   :  { %352 = vmatprep.subr.bf16.mxu1 %v1277_v39  ;;  %v1341_v39 = vld [vmem:[#allocation7 + $0x120] ss:$8 sps:$4 sm:$0xff]  }
  0x7c   :  { %815 = vmatpush1.bf16.msra.mxu0 %v1319_v55 }
  0x7d   :  { %353 = vmatpush1.bf16.msra.mxu1 %v1275_v41  ;;  %816 = vmatprep.subr.bf16.mxu0 %v1320_v56  ;;  %v1344_v41 = vld [vmem:[#allocation7 + $0x130] ss:$8 sps:$4 sm:$0xff]  }
  0x7e   :  { %354 = vmatprep.subr.bf16.mxu1 %v1280_v43  ;;  %v1347_v43 = vld [vmem:[#allocation7 + $0x140] ss:$8 sps:$4 sm:$0xff]  }
  0x80   :  { %817 = vmatpush1.bf16.msra.mxu0 %v1322_v57 }
  0x81   :  { %355 = vmatpush1.bf16.msra.mxu1 %v1278_v45  ;;  %818 = vmatprep.subr.bf16.mxu0 %v1323_v58  ;;  %v125_v45 = vsub.s32 2, %v1620_v15  ;;  %v1179_v15 = vld [vmem:[%s1662_s4 + $0x6] ss:$0 sm:$0xff] }
  0x82   :  { %356 = vmatprep.subr.bf16.mxu1 %v1283_v47  ;;  %v1350_v47 = vld [vmem:[#allocation7 + $0x150] ss:$8 sps:$4 sm:$0xff]  }
  0x84   :  { %819 = vmatpush1.bf16.msra.mxu0 %v1325_v59 }
  0x85   :  { %357 = vmatpush1.bf16.msra.mxu1 %v1281_v49  ;;  %820 = vmatprep.subr.bf16.mxu0 %v1326_v60  ;;  %v126_v49 = vrot.slane %v77_v17, %v125_v45  ;;  %v1374_v17 = vld [vmem:[#allocation7 + $0x1d0] ss:$8 sps:$4 sm:$0xff]  }
  0x86   :  { %358 = vmatprep.subr.bf16.mxu1 %v1286_v51  ;;  %v1353_v51 = vld [vmem:[#allocation7 + $0x160] ss:$8 sps:$4 sm:$0xff]  }
  0x88   :  { %821 = vmatpush1.bf16.msra.mxu0 %v1328_v61  ;;  %v1356_v61 = vld [vmem:[#allocation7 + $0x170] ss:$8 sps:$4 sm:$0xff]  }
  0x89   :  { %359 = vmatpush1.bf16.msra.mxu1 %v1284_v53  ;;  %822 = vmatprep.subr.bf16.mxu0 %v1329_v62  ;;  %v1358_v53 = vld [vmem:[#allocation7 + $0x174] ss:$8 sps:$4 sm:$0xff]  }
  0x8a   :  { %1196 = vmatprep.subr.bf16.mxu1 %v1383_v3 }
  0x8c   :  { %377 = vmatmul.mubr.bf16.vlgmr.msra.gmra.mrb[4].mxu1 %v1616_v23  ;;  %823 = vmatpush1.bf16.msra.mxu0 %v1331_v63 }
  0x8d   :  { %824 = vmatprep.subr.bf16.mxu0 %v1332_v0  ;;  %1197 = vmatpush3.bf16.msra.mxu1 %v1384_v4  ;;  %v1361_v0 = vld [vmem:[#allocation7 + $0x184] ss:$8 sps:$4 sm:$0xff]   ;;  %v1359_v4 = vld [vmem:[#allocation7 + $0x180] ss:$8 sps:$4 sm:$0xff]  }
  0x8e   :  { %1198 = vmatprep.subr.bf16.mxu1 %v1385_v5 }
  0x90   :  { %825 = vmatpush1.bf16.msra.mxu0 %v1334_v1 }
  0x91   :  { %837 = vmatprep.subr.bf16.mxu0 %v1337_v2  ;;  %1199 = vmatpush3.bf16.msra.mxu1 %v1386_v6  ;;  %v1364_v6 = vld [vmem:[#allocation7 + $0x194] ss:$8 sps:$4 sm:$0xff]  }
  0x92   :  { %1200 = vmatprep.subr.bf16.mxu1 %v1387_v7  ;;  %v1362_v7 = vld [vmem:[#allocation7 + $0x190] ss:$8 sps:$4 sm:$0xff]  }
  0x95   :  { %1201 = vmatpush3.bf16.msra.mxu1 %v1388_v8  ;;  %v1367_v8 = vld [vmem:[#allocation7 + $0x1a4] ss:$8 sps:$4 sm:$0xff]  }
  0x96   :  { %1202 = vmatprep.subr.bf16.mxu1 %v1389_v9  ;;  %v1365_v9 = vld [vmem:[#allocation7 + $0x1a0] ss:$8 sps:$4 sm:$0xff]  }
  0x99   :  { %1203 = vmatpush3.bf16.msra.mxu1 %v1390_v10  ;;  %v1370_v10 = vld [vmem:[#allocation7 + $0x1b4] ss:$8 sps:$4 sm:$0xff]  }
  0x9a   :  { %1204 = vmatprep.subr.bf16.mxu1 %v1391_v11  ;;  %v1368_v11 = vld [vmem:[#allocation7 + $0x1b0] ss:$8 sps:$4 sm:$0xff]  }
  0x9d   :  { %1205 = vmatpush3.bf16.msra.mxu1 %v1392_v12  ;;  %v1373_v12 = vld [vmem:[#allocation7 + $0x1c4] ss:$8 sps:$4 sm:$0xff]  }
  0x9e   :  { %1206 = vmatprep.subr.bf16.mxu1 %v1393_v13  ;;  %v1371_v13 = vld [vmem:[#allocation7 + $0x1c0] ss:$8 sps:$4 sm:$0xff]  }
 0x13f   :  { %v335_v21 = vpop.f32.mrb[0].mxu1 }
 0x140   :  { %v336_v22 = vadd.f32 %v335_v21, %v118_v19  ;;  %v337_v23 = vpop.f32.mrb[1].mxu1  ;;  %v1382_v21 = vld [vmem:[#allocation7 + $0x1f4] ss:$8 sps:$4 sm:$0xff]  }
 0x141   :  { %v338_v24 = vadd.f32 %v337_v23, %v122_v20  ;;  %v339_v25 = vpop.f32.mrb[2].mxu1  ;;  %v1394_v23 = vld [vmem:[#allocation8 + $0x28] sm:$0xff]  }
 0x142   :  { %v340_v26 = vadd.f32 %v339_v25, %v118_v19  ;;  %v341_v27 = vpop.f32.mrb[3].mxu1  ;;  %v387_v29 = vmax.f32 %v336_v22, 0.0  ;;  %v1379_v19 = vld [vmem:[#allocation7 + $0x1e4] ss:$8 sps:$4 sm:$0xff]   ;;  %v1380_v22 = vld [vmem:[#allocation7 + $0x1f0] ss:$8 sps:$4 sm:$0xff]   ;;  %1207 = vmatpush3.bf16.msra.mxu1 %v1394_v23 }
 0x143   :  { %v342_v28 = vadd.f32 %v341_v27, %v122_v20  ;;  %v388_v31 = vmax.f32 %v338_v24, 0.0  ;;  %v1377_v20 = vld [vmem:[#allocation7 + $0x1e0] ss:$8 sps:$4 sm:$0xff]   ;;  %v1395_v24 = vld [vmem:[#allocation8 + $0x70] sm:$0xff]   ;;  %v1398_v27 = vld [vmem:[#allocation8 + $0x38] sm:$0xff]  }
 0x144   :  { %v391_v30 = vmax.f32 %v340_v26, 0.0  ;;  %v1396_v25 = vld [vmem:[#allocation8 + $0x30] sm:$0xff]   ;;  %1208 = vmatprep.subr.bf16.mxu1 %v1395_v24  ;;  %v1397_v26 = vld [vmem:[#allocation8 + $0x78] sm:$0xff]  }
 0x145   :  { %v392_v32 = vmax.f32 %v342_v28, 0.0  ;;  %v78_v28 = vld [vmem:[%s1662_s4 + $0x4] sm:$0x3] }
 0x146   :  { %v395_v33 = vpack.c.bf16 %v391_v30, %v387_v29  ;;  %1209 = vmatpush3.bf16.msra.mxu1 %v1396_v25  ;;  %v467_v29 = vrot.slane %v78_v28, %v117_v16  ;;  %v471_v30 = vrot.slane %v78_v28, %v121_v18 }
 0x147   :  { %v396_v34 = vpack.c.bf16 %v392_v32, %v388_v31  ;;  %1210 = vmatprep.subr.bf16.mxu1 %v1397_v26 }
 0x149   :  { %826 = vmatprep.mubr.bf16.mxu0 %v396_v34 }
 0x14a   :  { %827 = vmatmul.mubr.bf16.vlgmr.msra.gmra.mrb[0].mxu0 %v395_v33  ;;  %1211 = vmatpush3.bf16.msra.mxu1 %v1398_v27 }
 0x14b   :  { %838 = vmatpush1.bf16.msra.mxu0 %v1335_v35 }
 0x14c   :  { %839 = vmatprep.subr.bf16.mxu0 %v1340_v36 }
 0x14f   :  { %840 = vmatpush1.bf16.msra.mxu0 %v1338_v37 }
 0x150   :  { %841 = vmatprep.subr.bf16.mxu0 %v1343_v38 }
 0x153   :  { %842 = vmatpush1.bf16.msra.mxu0 %v1341_v39 }
 0x154   :  { %843 = vmatprep.subr.bf16.mxu0 %v1346_v40 }
 0x157   :  { %844 = vmatpush1.bf16.msra.mxu0 %v1344_v41 }
 0x158   :  { %845 = vmatprep.subr.bf16.mxu0 %v1349_v42 }
 0x15b   :  { %846 = vmatpush1.bf16.msra.mxu0 %v1347_v43 }
 0x15c   :  { %847 = vmatprep.subr.bf16.mxu0 %v1352_v44 }
 0x15f   :  { %848 = vmatpush1.bf16.msra.mxu0 %v1350_v47  ;;  %v378_v52 = vpop.f32.mrb[4].mxu1 }
 0x160   :  { %849 = vmatprep.subr.bf16.mxu0 %v1355_v48  ;;  %v379_v54 = vadd.f32 %v378_v52, %v126_v49  ;;  %v380_v55 = vpop.f32.mrb[5].mxu1 }
 0x161   :  { %v381_v56 = vadd.f32 %v380_v55, %v130_v50  ;;  %v382_v57 = vpop.f32.mrb[6].mxu1 }
 0x162   :  { %v389_v58 = vmax.f32 %v379_v54, 0.0  ;;  %v383_v59 = vadd.f32 %v382_v57, %v126_v49  ;;  %v384_v60 = vpop.f32.mrb[7].mxu1 }
 0x163   :  { %850 = vmatpush1.bf16.msra.mxu0 %v1353_v51  ;;  %v390_v62 = vmax.f32 %v381_v56, 0.0  ;;  %v385_v63 = vadd.f32 %v384_v60, %v130_v50 }
 0x164   :  { %851 = vmatprep.subr.bf16.mxu0 %v1358_v53  ;;  %v393_v1 = vmax.f32 %v383_v59, 0.0 }
 0x165   :  { %v394_v2 = vmax.f32 %v385_v63, 0.0 }
 0x166   :  { %v397_v3 = vpack.c.bf16 %v393_v1, %v389_v58 }
 0x167   :  { %852 = vmatpush1.bf16.msra.mxu0 %v1356_v61  ;;  %v398_v5 = vpack.c.bf16 %v394_v2, %v390_v62 }
 0x168   :  { %853 = vmatprep.subr.bf16.mxu0 %v1361_v0 }
 0x169   :  { %869 = vmatprep.mubr.bf16.mxu0 %v398_v5 }
 0x16b   :  { %854 = vmatpush1.bf16.msra.mxu0 %v1359_v4 }
 0x16c   :  { %855 = vmatprep.subr.bf16.mxu0 %v1364_v6 }
 0x16f   :  { %856 = vmatpush1.bf16.msra.mxu0 %v1362_v7 }
 0x170   :  { %857 = vmatprep.subr.bf16.mxu0 %v1367_v8 }
 0x173   :  { %858 = vmatpush1.bf16.msra.mxu0 %v1365_v9 }
 0x174   :  { %859 = vmatprep.subr.bf16.mxu0 %v1370_v10 }
 0x177   :  { %860 = vmatpush1.bf16.msra.mxu0 %v1368_v11 }
 0x178   :  { %861 = vmatprep.subr.bf16.mxu0 %v1373_v12 }
 0x17b   :  { %862 = vmatpush1.bf16.msra.mxu0 %v1371_v13 }
 0x17c   :  { %863 = vmatprep.subr.bf16.mxu0 %v1376_v14 }
 0x17f   :  { %864 = vmatpush1.bf16.msra.mxu0 %v1374_v17 }
 0x180   :  { %865 = vmatprep.subr.bf16.mxu0 %v1379_v19 }
 0x183   :  { %866 = vmatpush1.bf16.msra.mxu0 %v1377_v20 }
 0x184   :  { %867 = vmatprep.subr.bf16.mxu0 %v1382_v21 }
 0x187   :  { %868 = vmatpush1.bf16.msra.mxu0 %v1380_v22 }
 0x18a   :  { %870 = vmatmul.mubr.bf16.vlgmr.msra.gmra.mrb[0].mxu0 %v397_v3 }
 0x25d   :  { %v871_v31 = vpop.f32.mrb[0].mxu0 }
 0x25e   :  { %v1218_v32 = vadd.f32 %v871_v31, %v467_v29  ;;  %v873_v33 = vpop.f32.mrb[1].mxu0 }
 0x25f   :  { %v1219_v34 = vadd.f32 %v873_v33, %v471_v30  ;;  %v875_v35 = vpop.f32.mrb[2].mxu0 }
 0x260   :  { %v1220_v36 = vadd.f32 %v875_v35, %v467_v29  ;;  %v877_v37 = vpop.f32.mrb[3].mxu0  ;;  %v880_v39 = vmax.f32 %v1218_v32, 0.0 }
 0x261   :  { %v1221_v38 = vadd.f32 %v877_v37, %v471_v30  ;;  %v881_v41 = vmax.f32 %v1219_v34, 0.0 }
 0x262   :  { %v882_v40 = vmax.f32 %v1220_v36, 0.0 }
 0x263   :  { %v883_v42 = vmax.f32 %v1221_v38, 0.0 }
 0x264   :  { %v884_v43 = vpack.c.bf16 %v882_v40, %v880_v39 }
 0x265   :  { %v885_v44 = vpack.c.bf16 %v883_v42, %v881_v41 }
 0x267   :  { %1052 = vmatprep.mubr.bf16.mxu1 %v885_v44 }
 0x268   :  { %1053 = vmatmul.mubr.bf16.vlgmr.msra.gmra.mrb[8].mxu1 %v884_v43 }
 0x33b   :  { %v1212_v16 = vpop.f32.mrb[8].mxu1 }
 0x33c   :  { %v1213_v18 = vpop.f32.mrb[9].mxu1 }
 0x33d   :  { %v1214_v45 = vadd.f32 %v1213_v18, %v1212_v16  ;;  %v1215_v46 = vpop.f32.mrb[10].mxu1 }
 0x33e   :  { %v1216_v47 = vpop.f32.mrb[11].mxu1 }
 0x33f   :  { %v1055_v48 = vadd.f32 %v1214_v45, %v1179_v15  ;;  %v1217_v49 = vadd.f32 %v1216_v47, %v1215_v46 }
 0x341   :  { %1061 = vst [vmem:[#allocation10] sm:$0xff] %v1055_v48  ;;  %v1058_v50 = vadd.f32 %v1217_v49, %v1179_v15 }
 0x343   :  { %1062 = vst [vmem:[#allocation10 + $0x8] sm:$0xff] %v1058_v50 }
 0x344   :  { %1498 = shalt.err (!%p1495_p8)
}
 0x345   :  { %s1499_s27 = scalar_lea.hbm %s1663_s5, 256 }
 0x346   :  { %p1500_p9 = scmp.ne.s32.totalorder %s1663_s5, %s1499_s27  ;;  %p1503_p10 = scmp.lt.u32.totalorder %s1499_s27, %s1663_s5 }
 0x348   :  { %p1505_p11 = pnand %p1503_p10, %p1500_p9 }
 0x34a   :  { %1508 = shalt.err (!%p1505_p11)
}
 0x34b   :  { %1074 = dma.vmem_to_hbm [thread:$0]  %s1069_s24, 256, %s1663_s5, [#allocation4], %s1524_s0, %s1524_s0, %s1525_s30  }
 0x34c   :  { %1515 = dma.done.wait [#allocation4], 256  }
 0x34d   :  { %1516 = vsyncadd [#allocation4], 4294967040 }
 0x34e   :  { %1078 = vsyncpa [#allocation3], 1 }
 0x34f   :  { %1079 = vsyncpa [#allocation6], 1 }
 0x350   :  { %1080 = vsyncpa [#allocation9], 1 }
 0x351   :  { %1081 = vsyncpa [#allocation4], 1 }

</bundles_post_ra>
